<compile_context>
chip_gen: v6e
topology: v6e:2x2x1
jax: 0.10.0
libtpu: 0.0.40
codegen_flags: <defaults>
</compile_context>

<pallas_src>
import numpy as np
import jax
import jax.numpy as jnp
from jax.experimental import pallas as pl
from jax.experimental.pallas import tpu as pltpu

H = 50              # real hidden size / conv out channels
HP = 64             # per-direction lane padding (50 -> 64)
H2 = 2 * HP         # merged [fwd | bwd] width = one 128-lane vreg
G8 = 4 * H2         # 4 gates x (fwd|bwd)                       = 512
FC1P = 128          # fc1 output 25 -> padded 128
IN_FEAT = 4
KSIZE = 3
F32 = jnp.float32


def _vmem():
    return pl.BlockSpec(memory_space=pltpu.MemorySpace.VMEM)


# ----------------------------- fused Pallas kernel -------------------------------

def model2_fused_kernel(x_ref, wcomb_ref, bcomb_ref, whh_ref, mask_ref,
                        w1_ref, b1_ref, w2_ref, b2_ref, o_ref):
    # x:     (T, N, C)     T = torch batch (= LSTM time axis), N = torch sequence
    # wcomb: (3C, G8)      conv taps composed with W_ih, gate-interleaved layout
    # bcomb: (1, G8)       b_conv@W_ih + b_ih + b_hh, same layout
    # whh:   (H2, G8)      recurrent weights: fwd rows 0:HP -> fwd halves of each gate,
    #                      bwd rows HP:H2 -> bwd halves (block structure, rest zero)
    # mask:  (T, N, H2)    pre-scaled dropout mask, padded layout
    # w1:    (N*H2, FC1P)  fc1 weights flattened over (n, padded hidden)
    # b1:    (1, FC1P)     w2: (FC1P, 1)   b2: (1, 1)   o: (T, 1)
    T, N, C = x_ref.shape

    # ---- 3-tap 'same'-padding conv window on the raw 4-feature inputs, all T --------
    row = jax.lax.broadcasted_iota(jnp.int32, (N, C), 0)
    windows = []
    for t in range(T):
        xt = x_ref[t]                                                        # (N, C)
        left = jnp.where(row == 0, 0.0, pltpu.roll(xt, shift=1, axis=0))     # x[n-1]
        right = jnp.where(row == N - 1, 0.0,
                          pltpu.roll(xt, shift=N - 1, axis=0))               # x[n+1]
        windows.append(jnp.concatenate([left, xt, right], axis=1))           # (N, 3C)
    xw = jnp.concatenate(windows, axis=0)                                    # (T*N, 3C)

    # ---- conv ∘ input-projection: ONE matmul produces every gate pre-activation -----
    gx_all = jnp.dot(xw, wcomb_ref[...], preferred_element_type=F32) + bcomb_ref[...]
    gx = [gx_all[t * N:(t + 1) * N, :] for t in range(T)]                    # each (N, G8)

    # per-step input pre-acts: fwd half from time s, bwd half from time T-1-s
    lane_g = jax.lax.broadcasted_iota(jnp.int32, (N, G8), 1)
    fwd_cols = (lane_g % H2) < HP
    pre_x = [jnp.where(fwd_cols, gx[s], gx[T - 1 - s]) for s in range(T)]

    # ---- merged-direction bidirectional LSTM recurrence (statically unrolled) -------
    whh = whh_ref[...]
    h = jnp.zeros((N, H2), F32)          # [h_fwd | h_bwd]
    c = jnp.zeros((N, H2), F32)          # [c_fwd | c_bwd]
    h_steps = [None] * T
    for s in range(T):
        pre = pre_x[s]
        if s > 0:            # zero initial state -> recurrent term vanishes at step 0
            pre = pre + jnp.dot(h, whh, preferred_element_type=F32)          # (N, G8)
        i = jax.nn.sigmoid(pre[:, 0 * H2:1 * H2])
        f = jax.nn.sigmoid(pre[:, 1 * H2:2 * H2])
        g = jnp.tanh(pre[:, 2 * H2:3 * H2])
        o = jax.nn.sigmoid(pre[:, 3 * H2:4 * H2])
        c = f * c + i * g
        h = o * jnp.tanh(c)
        h_steps[s] = h
    # padded lanes stay exactly 0: padded weight columns / bias entries are 0, so
    # i=f=o=0.5, g=0 -> c stays 0 -> h = 0.5*tanh(0) = 0.

    # ---- relu -> dropout -> flatten -> fc1 -> relu -> fc2 (all T in one shot) -------
    lane_h = jax.lax.broadcasted_iota(jnp.int32, (N, H2), 1)
    fwd_half = lane_h < HP
    rows = []
    for t in range(T):
        # hidden(t) = [h_fwd(t) | h_bwd(t)]: fwd produced at step t, bwd at step T-1-t
        hid = jnp.where(fwd_half, h_steps[t], h_steps[T - 1 - t])            # (N, H2)
        hm = jnp.maximum(hid, 0.0) * mask_ref[t]                             # (N, H2)
        rows.append(jnp.concatenate([hm[n:n + 1, :] for n in range(N)], axis=1))
    hm_flat = jnp.concatenate(rows, axis=0)                                  # (T, N*H2)

    y = jnp.dot(hm_flat, w1_ref[...], preferred_element_type=F32) + b1_ref[...]
    y = jnp.maximum(y, 0.0)                                                  # (T, FC1P)
    o_ref[...] = jnp.dot(y, w2_ref[...], preferred_element_type=F32) + b2_ref[...]


# ----------------------------- one-time host-side parameter shaping ---------------

def _pad_to(a, shape):
    out = jnp.zeros(shape, F32)
    return out.at[tuple(slice(0, d) for d in a.shape)].set(a.astype(F32))


def prepare_params(p, sequence):
    """One-time weight shaping. Call once; keep the result out of the per-call path."""
    S = sequence

    # input->gate weights in gate-interleaved layout [i_f|i_b|f_f|f_b|g_f|g_b|o_f|o_b],
    # each half-gate padded 50 -> 64 output columns; input rows kept at the real 50.
    cols = []
    for g in range(4):
        cols.append(_pad_to(p['wih_f'][g * H:(g + 1) * H, :].T, (H, HP)))
        cols.append(_pad_to(p['wih_b'][g * H:(g + 1) * H, :].T, (H, HP)))
    wih = jnp.concatenate(cols, axis=1)                                      # (H, G8)

    bf = p['bih_f'] + p['bhh_f']
    bb = p['bih_b'] + p['bhh_b']
    bcols = []
    for g in range(4):
        bcols.append(_pad_to(bf[g * H:(g + 1) * H].reshape(1, H), (1, HP)))
        bcols.append(_pad_to(bb[g * H:(g + 1) * H].reshape(1, H), (1, HP)))
    ball = jnp.concatenate(bcols, axis=1)                                    # (1, G8)

    # compose the Conv1d taps with W_ih:  gx = [x_{n-1}|x_n|x_{n+1}] @ wcomb + bcomb
    w_taps = jnp.concatenate(
        [p['conv_w'][:, :, k].T.astype(F32) for k in range(KSIZE)], axis=0)  # (3C, H)
    wcomb = w_taps @ wih                                                     # (3C, G8)
    bcomb = p['conv_b'].reshape(1, H).astype(F32) @ wih + ball               # (1, G8)

    # recurrent weights, block layout: fwd hidden rows feed only fwd gate halves
    whh = jnp.zeros((H2, G8), F32)
    for g in range(4):
        whh = whh.at[0:H, g * H2:g * H2 + H].set(
            p['whh_f'][g * H:(g + 1) * H, :].T.astype(F32))
        whh = whh.at[HP:HP + H, g * H2 + HP:g * H2 + HP + H].set(
            p['whh_b'][g * H:(g + 1) * H, :].T.astype(F32))

    # fc1 (25, S*100) -> flattened, padded (S*H2, FC1P) matching the kernel flatten order
    w1r = p['fc1_w'].astype(F32).T.reshape(S, 2 * H, 25)   # [s, h, p]; h<50 fwd, >=50 bwd
    w1_3 = jnp.zeros((S, H2, 25), F32)
    w1_3 = w1_3.at[:, 0:H, :].set(w1r[:, 0:H, :])
    w1_3 = w1_3.at[:, HP:HP + H, :].set(w1r[:, H:2 * H, :])
    w1 = _pad_to(w1_3.reshape(S * H2, 25), (S * H2, FC1P))

    b1 = _pad_to(p['fc1_b'].reshape(1, 25), (1, FC1P))
    w2 = _pad_to(p['fc2_w'].T, (FC1P, 1))
    b2 = p['fc2_b'].reshape(1, 1).astype(F32)

    return wcomb, bcomb, whh, w1, b1, w2, b2


def model2_forward(x, dropout_mask, wcomb, bcomb, whh, w1, b1, w2, b2):
    """Jitted per-call path: nothing but the fused pallas_call."""
    B = x.shape[0]
    return pl.pallas_call(
        model2_fused_kernel,
        out_shape=jax.ShapeDtypeStruct((B, 1), jnp.float32),
        in_specs=[_vmem()] * 9,
        out_specs=_vmem(),
    )(x, wcomb, bcomb, whh, dropout_mask, w1, b1, w2, b2)


# ----------------------------- deterministic parameter init ----------------------

def init_params(key, sequence):
    ks = jax.random.split(key, 14)

    def u(k, shape, fan_in):
        bound = 1.0 / np.sqrt(fan_in)
        return jax.random.uniform(k, shape, jnp.float32, -bound, bound)

    p = {}
    p['conv_w'] = u(ks[0], (H, IN_FEAT, KSIZE), IN_FEAT * KSIZE)
    p['conv_b'] = u(ks[1], (H,), IN_FEAT * KSIZE)
    p['wih_f'] = u(ks[2], (4 * H, H), H)
    p['whh_f'] = u(ks[3], (4 * H, H), H)
    p['bih_f'] = u(ks[4], (4 * H,), H)
    p['bhh_f'] = u(ks[5], (4 * H,), H)
    p['wih_b'] = u(ks[6], (4 * H, H), H)
    p['whh_b'] = u(ks[7], (4 * H, H), H)
    p['bih_b'] = u(ks[8], (4 * H,), H)
    p['bhh_b'] = u(ks[9], (4 * H,), H)
    p['fc1_w'] = u(ks[10], (25, sequence * 2 * H), sequence * 2 * H)
    p['fc1_b'] = u(ks[11], (25,), sequence * 2 * H)
    p['fc2_w'] = u(ks[12], (1, 25), 25)
    p['fc2_b'] = u(ks[13], (1,), 25)
    return p


# ----------------------------- pure-JAX reference (verification) ------------------

def reference_forward(x, p, dropout_mask):
    B, S, _ = x.shape
    xp = jnp.pad(x, ((0, 0), (1, 1), (0, 0)))
    conv = jnp.zeros((B, S, H), jnp.float32)
    for k in range(KSIZE):
        conv = conv + jnp.einsum('bsc,oc->bso', xp[:, k:k + S, :], p['conv_w'][:, :, k])
    conv = conv + p['conv_b']

    def run_dir(wih, whh, bih, bhh, rev):
        h = jnp.zeros((S, H), jnp.float32)
        c = jnp.zeros((S, H), jnp.float32)
        outs = [None] * B
        order = range(B - 1, -1, -1) if rev else range(B)
        for t in order:
            gates = conv[t] @ wih.T + bih + h @ whh.T + bhh
            i = jax.nn.sigmoid(gates[:, :H])
            f = jax.nn.sigmoid(gates[:, H:2 * H])
            g = jnp.tanh(gates[:, 2 * H:3 * H])
            o = jax.nn.sigmoid(gates[:, 3 * H:])
            c = f * c + i * g
            h = o * jnp.tanh(c)
            outs[t] = h
        return jnp.stack(outs)  # (B, S, H)

    fwd = run_dir(p['wih_f'], p['whh_f'], p['bih_f'], p['bhh_f'], False)
    bwd = run_dir(p['wih_b'], p['whh_b'], p['bih_b'], p['bhh_b'], True)
    out = jnp.concatenate([fwd, bwd], axis=-1)            # (B, S, 100)
    out = jax.nn.relu(out).reshape(B, -1) * dropout_mask
    y = jax.nn.relu(out @ p['fc1_w'].T + p['fc1_b'])
    return y @ p['fc2_w'].T + p['fc2_b']


# ----------------------------- main ----------------------------------------------

if __name__ == "__main__":
    B, S, C = 2, 8, 4          # batch=2, sequence=8, features=4 (Conv1d in-channels)
    key = jax.random.PRNGKey(0)
    kx, kp, kd = jax.random.split(key, 3)

    x = jax.random.normal(kx, (B, S, C), jnp.float32)
    params = init_params(kp, S)

    # func.dropout(p=0.5, training=True): deterministic JAX mask, pre-scaled by 1/(1-p),
    # generated directly in the padded (B, S, H2) layout (padded lanes are inert).
    keep = jax.random.bernoulli(kd, 0.5, (B, S, H2))
    mask_pad = keep.astype(jnp.float32) / 0.5

    prepped = prepare_params(params, S)                    # one-time weight shaping
    prepped = tuple(jax.block_until_ready(a) for a in prepped)

    run = jax.jit(model2_forward)
    out = jax.block_until_ready(run(x, mask_pad, *prepped))

    # verification against a pure-JAX re-implementation of the torch module
    mask_real = jnp.concatenate([mask_pad[:, :, 0:H], mask_pad[:, :, HP:HP + H]],
                                axis=-1).reshape(B, S * 2 * H)
    ref = reference_forward(x, params, mask_real)
    if not np.allclose(np.asarray(out), np.asarray(ref), rtol=1e-4, atol=1e-4):
        raise AssertionError("Pallas output does not match pure-JAX reference")

    print("KERNEL_OK")
</pallas_src>

<mosaic_0001>
module attributes {stable_mosaic.version = 11 : i64} {
  func.func @model2_fused_kernel(%arg0: memref<2x8x4xf32, #tpu.memory_space<vmem>>, %arg1: memref<12x512xf32, #tpu.memory_space<vmem>>, %arg2: memref<1x512xf32, #tpu.memory_space<vmem>>, %arg3: memref<128x512xf32, #tpu.memory_space<vmem>>, %arg4: memref<2x8x128xf32, #tpu.memory_space<vmem>>, %arg5: memref<1024x128xf32, #tpu.memory_space<vmem>>, %arg6: memref<1x128xf32, #tpu.memory_space<vmem>>, %arg7: memref<128x1xf32, #tpu.memory_space<vmem>>, %arg8: memref<1x1xf32, #tpu.memory_space<vmem>>, %arg9: memref<2x1xf32, #tpu.memory_space<vmem>>) attributes {dimension_semantics = [], scalar_prefetch = 0 : i64, scratch_operands = 0 : i64, tpu.core_type = #tpu.core_type<tc>} {
    %0 = tpu.iota {dimensions = array<i32: 0>} : vector<8x4xi32>
    %c0 = arith.constant 0 : index
    %c0_0 = arith.constant 0 : index
    %c0_1 = arith.constant 0 : index
    %1 = vector.load %arg0[%c0, %c0_0, %c0_1] : memref<2x8x4xf32, #tpu.memory_space<vmem>>, vector<1x8x4xf32>
    %2 = vector.shape_cast %1 : vector<1x8x4xf32> to vector<8x4xf32>
    %c0_i32 = arith.constant 0 : i32
    %3 = vector.broadcast %c0_i32 : i32 to vector<8x4xi32>
    %4 = arith.cmpi eq, %0, %3 : vector<8x4xi32>
    %c1_i32 = arith.constant 1 : i32
    %5 = tpu.dynamic_rotate %2 by %c1_i32 dim 0 : vector<8x4xf32>, i32 -> vector<8x4xf32>
    %cst = arith.constant 0.000000e+00 : f32
    %6 = vector.broadcast %cst : f32 to vector<8x4xf32>
    %7 = arith.select %4, %6, %5 : vector<8x4xi1>, vector<8x4xf32>
    %c7_i32 = arith.constant 7 : i32
    %8 = vector.broadcast %c7_i32 : i32 to vector<8x4xi32>
    %9 = arith.cmpi eq, %0, %8 : vector<8x4xi32>
    %c7_i32_2 = arith.constant 7 : i32
    %10 = tpu.dynamic_rotate %2 by %c7_i32_2 dim 0 : vector<8x4xf32>, i32 -> vector<8x4xf32>
    %cst_3 = arith.constant 0.000000e+00 : f32
    %11 = vector.broadcast %cst_3 : f32 to vector<8x4xf32>
    %12 = arith.select %9, %11, %10 : vector<8x4xi1>, vector<8x4xf32>
    %13 = tpu.concatenate %7, %2, %12 in 1 : vector<8x4xf32>, vector<8x4xf32>, vector<8x4xf32> -> vector<8x12xf32>
    %c1 = arith.constant 1 : index
    %c0_4 = arith.constant 0 : index
    %c0_5 = arith.constant 0 : index
    %14 = vector.load %arg0[%c1, %c0_4, %c0_5] : memref<2x8x4xf32, #tpu.memory_space<vmem>>, vector<1x8x4xf32>
    %15 = vector.shape_cast %14 : vector<1x8x4xf32> to vector<8x4xf32>
    %c0_i32_6 = arith.constant 0 : i32
    %16 = vector.broadcast %c0_i32_6 : i32 to vector<8x4xi32>
    %17 = arith.cmpi eq, %0, %16 : vector<8x4xi32>
    %c1_i32_7 = arith.constant 1 : i32
    %18 = tpu.dynamic_rotate %15 by %c1_i32_7 dim 0 : vector<8x4xf32>, i32 -> vector<8x4xf32>
    %cst_8 = arith.constant 0.000000e+00 : f32
    %19 = vector.broadcast %cst_8 : f32 to vector<8x4xf32>
    %20 = arith.select %17, %19, %18 : vector<8x4xi1>, vector<8x4xf32>
    %c7_i32_9 = arith.constant 7 : i32
    %21 = vector.broadcast %c7_i32_9 : i32 to vector<8x4xi32>
    %22 = arith.cmpi eq, %0, %21 : vector<8x4xi32>
    %c7_i32_10 = arith.constant 7 : i32
    %23 = tpu.dynamic_rotate %15 by %c7_i32_10 dim 0 : vector<8x4xf32>, i32 -> vector<8x4xf32>
    %cst_11 = arith.constant 0.000000e+00 : f32
    %24 = vector.broadcast %cst_11 : f32 to vector<8x4xf32>
    %25 = arith.select %22, %24, %23 : vector<8x4xi1>, vector<8x4xf32>
    %26 = tpu.concatenate %20, %15, %25 in 1 : vector<8x4xf32>, vector<8x4xf32>, vector<8x4xf32> -> vector<8x12xf32>
    %27 = tpu.concatenate %13, %26 in 0 : vector<8x12xf32>, vector<8x12xf32> -> vector<16x12xf32>
    %c0_12 = arith.constant 0 : index
    %c0_13 = arith.constant 0 : index
    %28 = vector.load %arg1[%c0_12, %c0_13] : memref<12x512xf32, #tpu.memory_space<vmem>>, vector<12x512xf32>
    %cst_14 = arith.constant dense<0.000000e+00> : vector<16x512xf32>
    %29 = tpu.matmul %27, %28, %cst_14 {dimension_numbers = #tpu.dot_dimension_numbers<[1], [0], [0], [1], [0, 0, 1, 1], [], []>} : vector<16x12xf32>, vector<12x512xf32>, vector<16x512xf32> -> vector<16x512xf32>
    %c0_15 = arith.constant 0 : index
    %c0_16 = arith.constant 0 : index
    %30 = vector.load %arg2[%c0_15, %c0_16] : memref<1x512xf32, #tpu.memory_space<vmem>>, vector<1x512xf32>
    %31 = vector.broadcast %30 : vector<1x512xf32> to vector<16x512xf32>
    %32 = arith.addf %29, %31 : vector<16x512xf32>
    %33 = vector.extract_strided_slice %32 {offsets = [0, 0], sizes = [8, 512], strides = [1, 1]} : vector<16x512xf32> to vector<8x512xf32>
    %34 = vector.extract_strided_slice %32 {offsets = [8, 0], sizes = [8, 512], strides = [1, 1]} : vector<16x512xf32> to vector<8x512xf32>
    %35 = tpu.iota {dimensions = array<i32: 1>} : vector<8x512xi32>
    %c128_i32 = arith.constant 128 : i32
    %c0_i32_17 = arith.constant 0 : i32
    %36 = arith.cmpi eq, %c128_i32, %c0_i32_17 : i32
    %c1_i32_18 = arith.constant 1 : i32
    %37 = arith.select %36, %c1_i32_18, %c128_i32 : i32
    %38 = vector.broadcast %37 : i32 to vector<8x512xi32>
    %39 = arith.remsi %35, %38 : vector<8x512xi32>
    %c0_i32_19 = arith.constant 0 : i32
    %40 = vector.broadcast %c0_i32_19 : i32 to vector<8x512xi32>
    %41 = arith.cmpi ne, %39, %40 : vector<8x512xi32>
    %c0_i32_20 = arith.constant 0 : i32
    %42 = vector.broadcast %c0_i32_20 : i32 to vector<8x512xi32>
    %43 = arith.cmpi slt, %39, %42 : vector<8x512xi32>
    %c0_i32_21 = arith.constant 0 : i32
    %44 = arith.cmpi slt, %37, %c0_i32_21 : i32
    %45 = vector.broadcast %44 : i1 to vector<8x512xi1>
    %46 = vector.broadcast %45 : vector<8x512xi1> to vector<8x512xi1>
    %47 = arith.xori %43, %46 : vector<8x512xi1>
    %48 = arith.andi %47, %41 : vector<8x512xi1>
    %49 = vector.broadcast %37 : i32 to vector<8x512xi32>
    %50 = arith.addi %39, %49 : vector<8x512xi32>
    %51 = arith.select %48, %50, %39 : vector<8x512xi1>, vector<8x512xi32>
    %c64_i32 = arith.constant 64 : i32
    %52 = vector.broadcast %c64_i32 : i32 to vector<8x512xi32>
    %53 = arith.cmpi slt, %51, %52 : vector<8x512xi32>
    %54 = arith.select %53, %33, %34 : vector<8x512xi1>, vector<8x512xf32>
    %55 = arith.select %53, %34, %33 : vector<8x512xi1>, vector<8x512xf32>
    %c0_22 = arith.constant 0 : index
    %c0_23 = arith.constant 0 : index
    %56 = vector.load %arg3[%c0_22, %c0_23] : memref<128x512xf32, #tpu.memory_space<vmem>>, vector<128x512xf32>
    %cst_24 = arith.constant 0.000000e+00 : f32
    %57 = vector.broadcast %cst_24 : f32 to vector<8x128xf32>
    %58 = vector.extract_strided_slice %54 {offsets = [0, 0], sizes = [8, 128], strides = [1, 1]} : vector<8x512xf32> to vector<8x128xf32>
    %59 = arith.negf %58 : vector<8x128xf32>
    %60 = math.exp %59 : vector<8x128xf32>
    %cst_25 = arith.constant 1.000000e+00 : f32
    %61 = vector.broadcast %cst_25 : f32 to vector<8x128xf32>
    %62 = arith.addf %61, %60 : vector<8x128xf32>
    %63 = arith.divf %61, %62 : vector<8x128xf32>
    %64 = vector.extract_strided_slice %54 {offsets = [0, 128], sizes = [8, 128], strides = [1, 1]} : vector<8x512xf32> to vector<8x128xf32>
    %65 = arith.negf %64 : vector<8x128xf32>
    %66 = math.exp %65 : vector<8x128xf32>
    %cst_26 = arith.constant 1.000000e+00 : f32
    %67 = vector.broadcast %cst_26 : f32 to vector<8x128xf32>
    %68 = arith.addf %67, %66 : vector<8x128xf32>
    %69 = arith.divf %67, %68 : vector<8x128xf32>
    %70 = vector.extract_strided_slice %54 {offsets = [0, 256], sizes = [8, 128], strides = [1, 1]} : vector<8x512xf32> to vector<8x128xf32>
    %71 = math.tanh %70 : vector<8x128xf32>
    %72 = vector.extract_strided_slice %54 {offsets = [0, 384], sizes = [8, 128], strides = [1, 1]} : vector<8x512xf32> to vector<8x128xf32>
    %73 = arith.negf %72 : vector<8x128xf32>
    %74 = math.exp %73 : vector<8x128xf32>
    %cst_27 = arith.constant 1.000000e+00 : f32
    %75 = vector.broadcast %cst_27 : f32 to vector<8x128xf32>
    %76 = arith.addf %75, %74 : vector<8x128xf32>
    %77 = arith.divf %75, %76 : vector<8x128xf32>
    %78 = arith.mulf %69, %57 : vector<8x128xf32>
    %79 = arith.mulf %63, %71 : vector<8x128xf32>
    %80 = arith.addf %78, %79 : vector<8x128xf32>
    %81 = math.tanh %80 : vector<8x128xf32>
    %82 = arith.mulf %77, %81 : vector<8x128xf32>
    %cst_28 = arith.constant dense<0.000000e+00> : vector<8x512xf32>
    %83 = tpu.matmul %82, %56, %cst_28 {dimension_numbers = #tpu.dot_dimension_numbers<[1], [0], [0], [1], [0, 0, 1, 1], [], []>} : vector<8x128xf32>, vector<128x512xf32>, vector<8x512xf32> -> vector<8x512xf32>
    %84 = arith.addf %55, %83 : vector<8x512xf32>
    %85 = vector.extract_strided_slice %84 {offsets = [0, 0], sizes = [8, 128], strides = [1, 1]} : vector<8x512xf32> to vector<8x128xf32>
    %86 = arith.negf %85 : vector<8x128xf32>
    %87 = math.exp %86 : vector<8x128xf32>
    %cst_29 = arith.constant 1.000000e+00 : f32
    %88 = vector.broadcast %cst_29 : f32 to vector<8x128xf32>
    %89 = arith.addf %88, %87 : vector<8x128xf32>
    %90 = arith.divf %88, %89 : vector<8x128xf32>
    %91 = vector.extract_strided_slice %84 {offsets = [0, 128], sizes = [8, 128], strides = [1, 1]} : vector<8x512xf32> to vector<8x128xf32>
    %92 = arith.negf %91 : vector<8x128xf32>
    %93 = math.exp %92 : vector<8x128xf32>
    %cst_30 = arith.constant 1.000000e+00 : f32
    %94 = vector.broadcast %cst_30 : f32 to vector<8x128xf32>
    %95 = arith.addf %94, %93 : vector<8x128xf32>
    %96 = arith.divf %94, %95 : vector<8x128xf32>
    %97 = vector.extract_strided_slice %84 {offsets = [0, 256], sizes = [8, 128], strides = [1, 1]} : vector<8x512xf32> to vector<8x128xf32>
    %98 = math.tanh %97 : vector<8x128xf32>
    %99 = vector.extract_strided_slice %84 {offsets = [0, 384], sizes = [8, 128], strides = [1, 1]} : vector<8x512xf32> to vector<8x128xf32>
    %100 = arith.negf %99 : vector<8x128xf32>
    %101 = math.exp %100 : vector<8x128xf32>
    %cst_31 = arith.constant 1.000000e+00 : f32
    %102 = vector.broadcast %cst_31 : f32 to vector<8x128xf32>
    %103 = arith.addf %102, %101 : vector<8x128xf32>
    %104 = arith.divf %102, %103 : vector<8x128xf32>
    %105 = arith.mulf %96, %80 : vector<8x128xf32>
    %106 = arith.mulf %90, %98 : vector<8x128xf32>
    %107 = arith.addf %105, %106 : vector<8x128xf32>
    %108 = math.tanh %107 : vector<8x128xf32>
    %109 = arith.mulf %104, %108 : vector<8x128xf32>
    %110 = tpu.iota {dimensions = array<i32: 1>} : vector<8x128xi32>
    %c64_i32_32 = arith.constant 64 : i32
    %111 = vector.broadcast %c64_i32_32 : i32 to vector<8x128xi32>
    %112 = arith.cmpi slt, %110, %111 : vector<8x128xi32>
    %113 = arith.select %112, %82, %109 : vector<8x128xi1>, vector<8x128xf32>
    %cst_33 = arith.constant 0.000000e+00 : f32
    %114 = vector.broadcast %cst_33 : f32 to vector<8x128xf32>
    %115 = arith.maximumf %113, %114 : vector<8x128xf32>
    %c0_34 = arith.constant 0 : index
    %c0_35 = arith.constant 0 : index
    %c0_36 = arith.constant 0 : index
    %116 = vector.load %arg4[%c0_34, %c0_35, %c0_36] : memref<2x8x128xf32, #tpu.memory_space<vmem>>, vector<1x8x128xf32>
    %117 = vector.shape_cast %116 : vector<1x8x128xf32> to vector<8x128xf32>
    %118 = arith.mulf %115, %117 : vector<8x128xf32>
    %119 = vector.extract_strided_slice %118 {offsets = [0, 0], sizes = [1, 128], strides = [1, 1]} : vector<8x128xf32> to vector<1x128xf32>
    %120 = vector.extract_strided_slice %118 {offsets = [1, 0], sizes = [1, 128], strides = [1, 1]} : vector<8x128xf32> to vector<1x128xf32>
    %121 = vector.extract_strided_slice %118 {offsets = [2, 0], sizes = [1, 128], strides = [1, 1]} : vector<8x128xf32> to vector<1x128xf32>
    %122 = vector.extract_strided_slice %118 {offsets = [3, 0], sizes = [1, 128], strides = [1, 1]} : vector<8x128xf32> to vector<1x128xf32>
    %123 = vector.extract_strided_slice %118 {offsets = [4, 0], sizes = [1, 128], strides = [1, 1]} : vector<8x128xf32> to vector<1x128xf32>
    %124 = vector.extract_strided_slice %118 {offsets = [5, 0], sizes = [1, 128], strides = [1, 1]} : vector<8x128xf32> to vector<1x128xf32>
    %125 = vector.extract_strided_slice %118 {offsets = [6, 0], sizes = [1, 128], strides = [1, 1]} : vector<8x128xf32> to vector<1x128xf32>
    %126 = vector.extract_strided_slice %118 {offsets = [7, 0], sizes = [1, 128], strides = [1, 1]} : vector<8x128xf32> to vector<1x128xf32>
    %127 = tpu.concatenate %119, %120, %121, %122, %123, %124, %125, %126 in 1 : vector<1x128xf32>, vector<1x128xf32>, vector<1x128xf32>, vector<1x128xf32>, vector<1x128xf32>, vector<1x128xf32>, vector<1x128xf32>, vector<1x128xf32> -> vector<1x1024xf32>
    %128 = arith.select %112, %109, %82 : vector<8x128xi1>, vector<8x128xf32>
    %cst_37 = arith.constant 0.000000e+00 : f32
    %129 = vector.broadcast %cst_37 : f32 to vector<8x128xf32>
    %130 = arith.maximumf %128, %129 : vector<8x128xf32>
    %c1_38 = arith.constant 1 : index
    %c0_39 = arith.constant 0 : index
    %c0_40 = arith.constant 0 : index
    %131 = vector.load %arg4[%c1_38, %c0_39, %c0_40] : memref<2x8x128xf32, #tpu.memory_space<vmem>>, vector<1x8x128xf32>
    %132 = vector.shape_cast %131 : vector<1x8x128xf32> to vector<8x128xf32>
    %133 = arith.mulf %130, %132 : vector<8x128xf32>
    %134 = vector.extract_strided_slice %133 {offsets = [0, 0], sizes = [1, 128], strides = [1, 1]} : vector<8x128xf32> to vector<1x128xf32>
    %135 = vector.extract_strided_slice %133 {offsets = [1, 0], sizes = [1, 128], strides = [1, 1]} : vector<8x128xf32> to vector<1x128xf32>
    %136 = vector.extract_strided_slice %133 {offsets = [2, 0], sizes = [1, 128], strides = [1, 1]} : vector<8x128xf32> to vector<1x128xf32>
    %137 = vector.extract_strided_slice %133 {offsets = [3, 0], sizes = [1, 128], strides = [1, 1]} : vector<8x128xf32> to vector<1x128xf32>
    %138 = vector.extract_strided_slice %133 {offsets = [4, 0], sizes = [1, 128], strides = [1, 1]} : vector<8x128xf32> to vector<1x128xf32>
    %139 = vector.extract_strided_slice %133 {offsets = [5, 0], sizes = [1, 128], strides = [1, 1]} : vector<8x128xf32> to vector<1x128xf32>
    %140 = vector.extract_strided_slice %133 {offsets = [6, 0], sizes = [1, 128], strides = [1, 1]} : vector<8x128xf32> to vector<1x128xf32>
    %141 = vector.extract_strided_slice %133 {offsets = [7, 0], sizes = [1, 128], strides = [1, 1]} : vector<8x128xf32> to vector<1x128xf32>
    %142 = tpu.concatenate %134, %135, %136, %137, %138, %139, %140, %141 in 1 : vector<1x128xf32>, vector<1x128xf32>, vector<1x128xf32>, vector<1x128xf32>, vector<1x128xf32>, vector<1x128xf32>, vector<1x128xf32>, vector<1x128xf32> -> vector<1x1024xf32>
    %143 = tpu.concatenate %127, %142 in 0 : vector<1x1024xf32>, vector<1x1024xf32> -> vector<2x1024xf32>
    %c0_41 = arith.constant 0 : index
    %c0_42 = arith.constant 0 : index
    %144 = vector.load %arg5[%c0_41, %c0_42] : memref<1024x128xf32, #tpu.memory_space<vmem>>, vector<1024x128xf32>
    %cst_43 = arith.constant dense<0.000000e+00> : vector<2x128xf32>
    %145 = tpu.matmul %143, %144, %cst_43 {dimension_numbers = #tpu.dot_dimension_numbers<[1], [0], [0], [1], [0, 0, 1, 1], [], []>} : vector<2x1024xf32>, vector<1024x128xf32>, vector<2x128xf32> -> vector<2x128xf32>
    %c0_44 = arith.constant 0 : index
    %c0_45 = arith.constant 0 : index
    %146 = vector.load %arg6[%c0_44, %c0_45] : memref<1x128xf32, #tpu.memory_space<vmem>>, vector<1x128xf32>
    %147 = vector.broadcast %146 : vector<1x128xf32> to vector<2x128xf32>
    %148 = arith.addf %145, %147 : vector<2x128xf32>
    %cst_46 = arith.constant 0.000000e+00 : f32
    %149 = vector.broadcast %cst_46 : f32 to vector<2x128xf32>
    %150 = arith.maximumf %148, %149 : vector<2x128xf32>
    %c0_47 = arith.constant 0 : index
    %c0_48 = arith.constant 0 : index
    %151 = vector.load %arg7[%c0_47, %c0_48] : memref<128x1xf32, #tpu.memory_space<vmem>>, vector<128x1xf32>
    %cst_49 = arith.constant dense<0.000000e+00> : vector<2x1xf32>
    %152 = tpu.matmul %150, %151, %cst_49 {dimension_numbers = #tpu.dot_dimension_numbers<[1], [0], [0], [1], [0, 0, 1, 1], [], []>} : vector<2x128xf32>, vector<128x1xf32>, vector<2x1xf32> -> vector<2x1xf32>
    %c0_50 = arith.constant 0 : index
    %c0_51 = arith.constant 0 : index
    %153 = vector.load %arg8[%c0_50, %c0_51] : memref<1x1xf32, #tpu.memory_space<vmem>>, vector<1x1xf32>
    %154 = vector.broadcast %153 : vector<1x1xf32> to vector<2x1xf32>
    %155 = arith.addf %152, %154 : vector<2x1xf32>
    %c0_52 = arith.constant 0 : index
    %c0_53 = arith.constant 0 : index
    %156 = vector.load %arg9[%c0_52, %c0_53] : memref<2x1xf32, #tpu.memory_space<vmem>>, vector<2x1xf32>
    tpu.vector_store %arg9[%c0_52, %c0_53], %155 {strides = array<i32>} : memref<2x1xf32, #tpu.memory_space<vmem>>, vector<2x1xf32>,
    return
  }
}

</mosaic_0001>

<bundles_post_ra>
// kernel: model2_forward.1
= control target key start
LH: loop header
LB: loop body
LE: loop exit
PB: predicated region body
PF: predicated region fallthrough
CT: control target
= control target key end

     0   :  { %s1823_s0 = inlined_call_operand.vmem [shape: f32[2,8,4], index: 0, kind: input, shape index: {}]   ;;  %s1824_s1 = inlined_call_operand.vmem [shape: f32[12,512], index: 1, kind: input, shape index: {}]   ;;  %s1825_s2 = inlined_call_operand.vmem [shape: f32[1,512], index: 2, kind: input, shape index: {}]   ;;  %s1826_s3 = inlined_call_operand.hbm [shape: f32[128,512], index: 3, kind: input, shape index: {}]   ;;  %s1827_s4 = inlined_call_operand.vmem [shape: f32[2,8,128], index: 4, kind: input, shape index: {}]   ;;  %s1828_s5 = inlined_call_operand.hbm [shape: f32[1024,128], index: 5, kind: input, shape index: {}]   ;;  %s1829_s6 = inlined_call_operand.vmem [shape: f32[1,128], index: 6, kind: input, shape index: {}]   ;;  %s1830_s7 = inlined_call_operand.vmem [shape: f32[128,1], index: 7, kind: input, shape index: {}]   ;;  %s1831_s8 = inlined_call_operand.<no memory space> [shape: f32[1,1], index: 8, kind: input, shape index: {}]   ;;  %s1832_s9 = inlined_call_operand.vmem [shape: f32[2,1], index: 9, kind: output, shape index: {}]  }
   0x1   :  { %v14_v0 = vstv %s1831_s8 }
   0x2   :  { %15 = vst [vmem:[#allocation2] sm:$0x1] %v14_v0 }
   0x3   :  { %16 = vsyncpa [#allocation4], 0 }
   0x4   :  { %17 = vsyncpa [#allocation6], 0  ;;  %s1501_s11 = smov [#allocation3]  }
   0x5   :  { %s29_s12 = sshll.u32 %s1501_s11, 4  ;;  %s30_s12 = int_to_ptr.vmem [resolvable:$true] %s29_s12 }
   0x6   :  { %s1465_s13 = scalar_lea.vmem %s30_s12, 8192  ;;  %p1470_p1 = scmp.lt.s32.totalorder %s30_s12, %s30_s12 }
   0x7   :  { %p1466_p0 = scmp.ne.s32.totalorder %s30_s12, %s1465_s13  ;;  %p1471_p2 = scmp.lt.s32.totalorder %s1465_s13, %s1465_s13 }
   0x9   :  { %p1472_p3 = por %p1471_p2, %p1470_p1 }
   0xb   :  { %p1473_p4 = pnand %p1472_p3, %p1466_p0 }
   0xd   :  { %1476 = shalt.err (!%p1473_p4)
}
   0xe   :  { %s1502_s14 = smov 512   ;;  %s1503_s15 = smov 32  }
   0xf   :  { %35 = dma.hbm_to_vmem [thread:$0]  %s1826_s3, 8192, %s30_s12, [#allocation4], %s1502_s14, %s1502_s14, %s1503_s15  }
  0x10   :  { %s1504_s8 = smov [#allocation5]  }
  0x11   :  { %s43_s18 = sshll.u32 %s1504_s8, 4  ;;  %s44_s18 = int_to_ptr.vmem [resolvable:$true] %s43_s18 }
  0x12   :  { %s1485_s19 = scalar_lea.vmem %s44_s18, 16384  ;;  %p1490_p6 = scmp.lt.s32.totalorder %s44_s18, %s44_s18 }
  0x13   :  { %p1486_p5 = scmp.ne.s32.totalorder %s44_s18, %s1485_s19  ;;  %p1491_p7 = scmp.lt.s32.totalorder %s1485_s19, %s1485_s19 }
  0x15   :  { %p1492_p8 = por %p1491_p7, %p1490_p6 }
  0x17   :  { %p1493_p9 = pnand %p1492_p8, %p1486_p5 }
  0x19   :  { %1496 = shalt.err (!%p1493_p9)
}
  0x1a   :  { %s1505_s20 = smov 128   ;;  %s1506_s21 = smov 8  }
  0x1b   :  { %49 = dma.hbm_to_vmem [thread:$0]  %s1828_s5, 16384, %s44_s18, [#allocation6], %s1505_s20, %s1505_s20, %s1506_s21  }
  0x1c   :  { %1497 = dma.done.wait [#allocation4], 8192  }
  0x1d   :  { %1498 = vsyncadd [#allocation4], 4294959104 }
  0x1e   :  { %1499 = dma.done.wait [#allocation6], 16384  }
  0x1f   :  { %1500 = vsyncadd [#allocation6], 4294950912  ;;  %v62_v1 = vlaneseq  ;;  %v1507_v2 = vmov 0.0   ;;  %vm136_vm0 = vcmask 1043456   ;;  %v64_v4 = vld [vmem:[%s1823_s0] sm:$0xff]  ;;  %v1200_v5 = vld [vmem:[%s1823_s0 + $0x8] sm:$0xff] }
  0x20   :  { %213 = vmatprep.mubr.f32.mxu1 %v1507_v2  ;;  %520 = vmatprep.mubr.f32.mxu0 %v1507_v2  ;;  %v104_v6 = vld [vmem:[%s1824_s1 + $0x28] sm:$0xf]  ;;  %s1508_s28 = smov 4   ;;  %v69_v7 = vrot.slane %v64_v4, 1  ;;  %v87_v8 = vrot.slane %v1200_v5, 1  ;;  %v99_v13 = vld [vmem:[%s1824_s1] sm:$0xff] }
  0x21   :  { %v1573_v3 = vshrl.u32 %v62_v1, 7  ;;  %72 = vrot.lane.b32.xlu0 %v64_v4, %s1508_s28  ;;  %90 = vrot.lane.b32.xlu1 %v1200_v5, %s1508_s28  ;;  %v103_v9 = vld [vmem:[%s1824_s1 + $0x20] sm:$0xf]  ;;  %v100_v10 = vld [vmem:[%s1824_s1 + $0x8] sm:$0xff]  ;;  %v66_v15 = vrot.slane %v64_v4, 7  ;;  %v85_v16 = vrot.slane %v1200_v5, 7 }
  0x22   :  { %1201 = vmatprep.subr.msk.mxu1 %vm136_vm0, %v104_v6  ;;  %v106_v14 = vld [vmem:[%s1824_s1 + $0x38] sm:$0xf]  ;;  %vm79_vm3 = vcmask 31744   ;;  %vm81_vm4 = vcmask 64512   ;;  %vm129_vm5 = vcmask 97280   ;;  %v101_v28 = vld [vmem:[%s1824_s1 + $0x10] sm:$0xff] }
  0x23   :  { %vm68_vm1 = vcmp.eq.s32.totalorder %v1573_v3, 7  ;;  %1202 = vmatpush1.msk.msra.mxu1 %vm136_vm0, %v103_v9  ;;  %vm65_vm2 = vcmp.eq.s32.totalorder %v1573_v3, 0  ;;  %v105_v23 = vld [vmem:[%s1824_s1 + $0x30] sm:$0xf]  ;;  %v102_v25 = vld [vmem:[%s1824_s1 + $0x18] sm:$0xff]  ;;  %v428_v32 = vld [vmem:[#allocation3 + $0x1e0] sm:$0xff] }
  0x24   :  { %v70_v11 = vsel %vm68_vm1, 0.0, %v69_v7  ;;  %v88_v12 = vsel %vm68_vm1, 0.0, %v87_v8  ;;  %179 = vmatprep.subr.mxu1 %v100_v10  ;;  %v67_v19 = vsel %vm65_vm2, 0.0, %v66_v15  ;;  %v86_v20 = vsel %vm65_vm2, 0.0, %v85_v16  ;;  %v429_v30 = vld [vmem:[#allocation3 + $0x1e8] sm:$0xff]  ;;  %v431_v31 = vld [vmem:[#allocation3 + $0x1f8] sm:$0xff] }
  0x25   :  { %76 = vrot.lane.b32.xlu0 %v70_v11, %s1506_s21  ;;  %94 = vrot.lane.b32.xlu1 %v88_v12, %s1506_s21  ;;  %v430_v33 = vld [vmem:[#allocation3 + $0x1f0] sm:$0xff]  ;;  %v425_v34 = vld [vmem:[#allocation3 + $0x1c8] sm:$0xff]  ;;  %v427_v35 = vld [vmem:[#allocation3 + $0x1d8] sm:$0xff]  ;;  %vm674_vm10 = vcmask 1040384   ;;  %vm1509_vm11 = vmmov 0   ;;  %vm1192_vm12 = vcmask 1024  }
  0x26   :  { %180 = vmatpush1.msra.mxu1 %v99_v13  ;;  %456 = vmatprep.subr.mxu0 %v429_v30  ;;  %v424_v36 = vld [vmem:[#allocation3 + $0x1c0] sm:$0xff]  ;;  %v426_v37 = vld [vmem:[#allocation3 + $0x1d0] sm:$0xff]  ;;  %v421_v38 = vld [vmem:[#allocation3 + $0x1a8] sm:$0xff] }
  0x27   :  { %1205 = vmatprep.subr.msk.mxu1 %vm136_vm0, %v106_v14  ;;  %457 = vmatpush1.msra.mxu0 %v428_v32  ;;  %v423_v39 = vld [vmem:[#allocation3 + $0x1b8] sm:$0xff]  ;;  %v420_v40 = vld [vmem:[#allocation3 + $0x1a0] sm:$0xff]  ;;  %v422_v41 = vld [vmem:[#allocation3 + $0x1b0] sm:$0xff] }
  0x28   :  { %458 = vmatprep.subr.mxu0 %v425_v34  ;;  %v417_v42 = vld [vmem:[#allocation3 + $0x188] sm:$0xff]  ;;  %v419_v43 = vld [vmem:[#allocation3 + $0x198] sm:$0xff]  ;;  %v416_v44 = vld [vmem:[#allocation3 + $0x180] sm:$0xff]  ;;  %v111_v34 = vsub.s32 0, %v1573_v3 }
  0x29   :  { %459 = vmatpush1.msra.mxu0 %v424_v36  ;;  %v418_v45 = vld [vmem:[#allocation3 + $0x190] sm:$0xff]  ;;  %v413_v46 = vld [vmem:[#allocation3 + $0x168] sm:$0xff]  ;;  %v415_v47 = vld [vmem:[#allocation3 + $0x178] sm:$0xff] }
  0x2a   :  { %460 = vmatprep.subr.mxu0 %v421_v38  ;;  %v412_v48 = vld [vmem:[#allocation3 + $0x160] sm:$0xff]  ;;  %v414_v49 = vld [vmem:[#allocation3 + $0x170] sm:$0xff]  ;;  %v409_v50 = vld [vmem:[#allocation3 + $0x148] sm:$0xff] }
  0x2b   :  { %461 = vmatpush1.msra.mxu0 %v420_v40  ;;  %v411_v51 = vld [vmem:[#allocation3 + $0x158] sm:$0xff]  ;;  %v408_v52 = vld [vmem:[#allocation3 + $0x140] sm:$0xff]  ;;  %v410_v53 = vld [vmem:[#allocation3 + $0x150] sm:$0xff] }
  0x2c   :  { %462 = vmatprep.subr.mxu0 %v417_v42  ;;  %v405_v54 = vld [vmem:[#allocation3 + $0x128] sm:$0xff]  ;;  %v407_v55 = vld [vmem:[#allocation3 + $0x138] sm:$0xff]  ;;  %v404_v56 = vld [vmem:[#allocation3 + $0x120] sm:$0xff] }
  0x2d   :  { %463 = vmatpush1.msra.mxu0 %v416_v44  ;;  %v406_v57 = vld [vmem:[#allocation3 + $0x130] sm:$0xff]  ;;  %v401_v58 = vld [vmem:[#allocation3 + $0x108] sm:$0xff]  ;;  %v403_v59 = vld [vmem:[#allocation3 + $0x118] sm:$0xff] }
  0x2e   :  { %464 = vmatprep.subr.mxu0 %v413_v46  ;;  %v400_v60 = vld [vmem:[#allocation3 + $0x100] sm:$0xff]  ;;  %v402_v61 = vld [vmem:[#allocation3 + $0x110] sm:$0xff]  ;;  %v397_v62 = vld [vmem:[#allocation3 + $0xe8] sm:$0xff]  ;;  %v119_v46 = vsub.s32 2, %v1573_v3 }
  0x2f   :  { %465 = vmatpush1.msra.mxu0 %v412_v48  ;;  %v399_v63 = vld [vmem:[#allocation3 + $0xf8] sm:$0xff]  ;;  %v396_v0 = vld [vmem:[#allocation3 + $0xe0] sm:$0xff]  ;;  %v398_v4 = vld [vmem:[#allocation3 + $0xf0] sm:$0xff] }
  0x30   :  { %466 = vmatprep.subr.mxu0 %v409_v50  ;;  %v393_v5 = vld [vmem:[#allocation3 + $0xc8] sm:$0xff]  ;;  %v395_v6 = vld [vmem:[#allocation3 + $0xd8] sm:$0xff]  ;;  %v392_v7 = vld [vmem:[#allocation3 + $0xc0] sm:$0xff] }
  0x31   :  { %467 = vmatpush1.msra.mxu0 %v408_v52  ;;  %v394_v8 = vld [vmem:[#allocation3 + $0xd0] sm:$0xff]  ;;  %v389_v9 = vld [vmem:[#allocation3 + $0xa8] sm:$0xff]  ;;  %v391_v10 = vld [vmem:[#allocation3 + $0xb8] sm:$0xff] }
  0x32   :  { %468 = vmatprep.subr.mxu0 %v405_v54  ;;  %v388_v11 = vld [vmem:[#allocation3 + $0xa0] sm:$0xff]  ;;  %v390_v12 = vld [vmem:[#allocation3 + $0xb0] sm:$0xff]  ;;  %v385_v13 = vld [vmem:[#allocation3 + $0x88] sm:$0xff] }
  0x33   :  { %469 = vmatpush1.msra.mxu0 %v404_v56  ;;  %v387_v14 = vld [vmem:[#allocation3 + $0x98] sm:$0xff]  ;;  %v384_v15 = vld [vmem:[#allocation3 + $0x80] sm:$0xff]  ;;  %v386_v16 = vld [vmem:[#allocation3 + $0x90] sm:$0xff] }
  0x34   :  { %470 = vmatprep.subr.mxu0 %v401_v58  ;;  %v371_v30 = vld [vmem:[#allocation3 + $0x18] sm:$0xff]  ;;  %v370_v32 = vld [vmem:[#allocation3 + $0x10] sm:$0xff] }
  0x35   :  { %471 = vmatpush1.msra.mxu0 %v400_v60 }
  0x36   :  { %472 = vmatprep.subr.mxu0 %v397_v62 }
  0x37   :  { %473 = vmatpush1.msra.mxu0 %v396_v0 }
  0x38   :  { %474 = vmatprep.subr.mxu0 %v393_v5 }
  0x39   :  { %475 = vmatpush1.msra.mxu0 %v392_v7 }
  0x3a   :  { %476 = vmatprep.subr.mxu0 %v389_v9 }
  0x3b   :  { %477 = vmatpush1.msra.mxu0 %v388_v11 }
  0x3c   :  { %478 = vmatprep.subr.mxu0 %v385_v13 }
  0x3d   :  { %479 = vmatpush1.msra.mxu0 %v384_v15 }
  0x93   :  { %v73_v17 = vpop.permute.xlu0 %72  ;;  %v91_v18 = vpop.permute.xlu1 %90 }
  0x94   :  { %v80_v21 = vsel %vm79_vm3, %v67_v19, %v73_v17  ;;  %v97_v26 = vsel %vm79_vm3, %v86_v20, %v91_v18  ;;  %v381_v17 = vld [vmem:[#allocation3 + $0x68] sm:$0xff]  ;;  %v383_v18 = vld [vmem:[#allocation3 + $0x78] sm:$0xff]  ;;  %v380_v19 = vld [vmem:[#allocation3 + $0x60] sm:$0xff] }
  0x95   :  { %v382_v20 = vld [vmem:[#allocation3 + $0x70] sm:$0xff]  ;;  %480 = vmatprep.subr.mxu0 %v381_v17 }
  0x96   :  { %481 = vmatpush1.msra.mxu0 %v380_v19 }
  0x97   :  { %v77_v22 = vpop.permute.xlu0 %76  ;;  %v95_v27 = vpop.permute.xlu1 %94 }
  0x98   :  { %v82_v24 = vsel %vm81_vm4, %v80_v21, %v77_v22  ;;  %v98_v29 = vsel %vm81_vm4, %v97_v26, %v95_v27  ;;  %v377_v21 = vld [vmem:[#allocation3 + $0x48] sm:$0xff]  ;;  %v379_v22 = vld [vmem:[#allocation3 + $0x58] sm:$0xff]  ;;  %v372_v27 = vld [vmem:[#allocation3 + $0x20] sm:$0xff] }
  0x99   :  { %1203 = vmatmul.mubr.msk.f32.vlgmr.msra.gmra.mxu1 %vm129_vm5, %v82_v24  ;;  %v375_v26 = vld [vmem:[#allocation3 + $0x38] sm:$0xff]  ;;  %482 = vmatprep.subr.mxu0 %v377_v21 }
  0x9a   :  { %219 = vmatprep.mubr.f32.mxu1 %v1507_v2  ;;  %1206 = vmatpush1.msk.msra.mxu1 %vm136_vm0, %v105_v23  ;;  %v376_v23 = vld [vmem:[#allocation3 + $0x40] sm:$0xff] }
  0x9b   :  { %256 = vmatprep.subr.mxu1 %v102_v25  ;;  %v373_v25 = vld [vmem:[#allocation3 + $0x28] sm:$0xff]  ;;  %483 = vmatpush1.msra.mxu0 %v376_v23 }
  0x9c   :  { %257 = vmatpush1.msra.mxu1 %v101_v28  ;;  %v374_v28 = vld [vmem:[#allocation3 + $0x30] sm:$0xff]  ;;  %484 = vmatprep.subr.mxu0 %v373_v25 }
  0x9d   :  { %1204 = vmatmul.mubr.msk.f32.gmra.mxu1 %vm129_vm5, %v98_v29  ;;  %527 = vmatprep.subr.mxu1 %v431_v31  ;;  %v368_v31 = vld [vmem:[#allocation3] sm:$0xff] }
  0x9e   :  { %290 = vmatprep.mubr.f32.mxu1 %v1507_v2  ;;  %485 = vmatpush1.msra.mxu0 %v372_v27 }
  0xa1   :  { %1207 = vmatmul.mubr.msk.f32.vlgmr.msra.gmra.mxu1 %vm129_vm5, %v82_v24  ;;  %v378_v24 = vld [vmem:[#allocation3 + $0x50] sm:$0xff] }
  0xa2   :  { %296 = vmatprep.mubr.f32.mxu1 %v1507_v2  ;;  %528 = vmatpush1.msra.mxu1 %v430_v33  ;;  %v1622_v33 = vand.u32 127, %v62_v1 }
  0xa3   :  { %529 = vmatprep.subr.mxu1 %v427_v35  ;;  %v107_v35 = vld [vmem:[%s1825_s2] sm:$0xf] }
  0xa4   :  { %530 = vmatpush1.msra.mxu1 %v426_v37  ;;  %v305_v36 = vadd.s32 128, %v1622_v33  ;;  %v115_v37 = vsub.s32 1, %v1573_v3  ;;  %vm356_vm6 = vcmp.lt.s32.totalorder %v1622_v33, 64  ;;  %v306_v1 = vadd.s32 256, %v1622_v33 }
  0xa5   :  { %1208 = vmatmul.mubr.msk.f32.gmra.mxu1 %vm129_vm5, %v98_v29  ;;  %531 = vmatprep.subr.mxu1 %v423_v39  ;;  %v369_v29 = vld [vmem:[#allocation3 + $0x8] sm:$0xff]  ;;  %v112_v39 = vrot.slane %v107_v35, %v111_v34  ;;  %v307_v50 = vadd.s32 384, %v1622_v33  ;;  %v120_v58 = vrot.slane %v107_v35, %v119_v46  ;;  %v698_v34 = vld [vmem:[#allocation5 + $0x78] sm:$0xff]  ;;  %v727_v46 = vld [vmem:[#allocation5 + $0x160] sm:$0xff] }
  0xa6   :  { %591 = vmatprep.mubr.f32.mxu1 %v1507_v2  ;;  %532 = vmatpush1.msra.mxu1 %v422_v41  ;;  %v319_v41 = vand.u32 127, %v305_v36  ;;  %v116_v42 = vrot.slane %v107_v35, %v115_v37  ;;  %v713_v36 = vld [vmem:[#allocation5 + $0xf0] sm:$0xff] }
  0xa7   :  { %533 = vmatprep.subr.mxu1 %v419_v43  ;;  %486 = vmatprep.subr.mxu0 %v369_v29  ;;  %v333_v62 = vand.u32 127, %v307_v50  ;;  %v745_v37 = vld [vmem:[#allocation5 + $0x1f0] sm:$0xff]  ;;  %v694_v50 = vld [vmem:[#allocation5 + $0x58] sm:$0xff] }
  0xa8   :  { %534 = vmatpush1.msra.mxu1 %v418_v45  ;;  %487 = vmatpush1.msra.mxu0 %v368_v31  ;;  %vm1633_vm7 = vcmp.lt.s32.totalorder %v319_v41, 64  ;;  %v714_v31 = vld [vmem:[#allocation5 + $0xf8] sm:$0xff]  ;;  %v744_v41 = vld [vmem:[#allocation5 + $0x1e8] sm:$0xff] }
  0xa9   :  { %535 = vmatprep.subr.mxu1 %v415_v47  ;;  %vm1665_vm9 = vcmp.lt.s32.totalorder %v333_v62, 64  ;;  %1224 = vmatprep.subr.mxu0 %v714_v31  ;;  %v724_v62 = vld [vmem:[#allocation5 + $0x148] sm:$0xff]  ;;  %v719_v31 = vld [vmem:[#allocation5 + $0x120] sm:$0xff] }
  0xaa   :  { %536 = vmatpush1.msra.mxu1 %v414_v49  ;;  %v123_v49 = vsub.s32 3, %v1573_v3 }
  0xab   :  { %537 = vmatprep.subr.mxu1 %v411_v51 }
  0xac   :  { %538 = vmatpush1.msra.mxu1 %v410_v53 }
  0xad   :  { %539 = vmatprep.subr.mxu1 %v407_v55 }
  0xae   :  { %540 = vmatpush1.msra.mxu1 %v406_v57  ;;  %v326_v57 = vand.u32 127, %v306_v1  ;;  %v711_v1 = vld [vmem:[#allocation5 + $0xe0] sm:$0xff] }
  0xaf   :  { %541 = vmatprep.subr.mxu1 %v403_v59 }
  0xb0   :  { %542 = vmatpush1.msra.mxu1 %v402_v61  ;;  %vm1657_vm8 = vcmp.lt.s32.totalorder %v326_v57, 64  ;;  %v693_v57 = vld [vmem:[#allocation5 + $0x50] sm:$0xff] }
  0xb1   :  { %543 = vmatprep.subr.mxu1 %v399_v63  ;;  %v124_v63 = vrot.slane %v107_v35, %v123_v49  ;;  %v730_v35 = vld [vmem:[#allocation5 + $0x178] sm:$0xff] }
  0xb2   :  { %544 = vmatpush1.msra.mxu1 %v398_v4  ;;  %v742_v49 = vld [vmem:[#allocation5 + $0x1d8] sm:$0xff] }
  0xb3   :  { %545 = vmatprep.subr.mxu1 %v395_v6 }
  0xb4   :  { %546 = vmatpush1.msra.mxu1 %v394_v8 }
  0xb5   :  { %547 = vmatprep.subr.mxu1 %v391_v10 }
  0xb6   :  { %548 = vmatpush1.msra.mxu1 %v390_v12 }
  0xb7   :  { %549 = vmatprep.subr.mxu1 %v387_v14 }
  0xb8   :  { %550 = vmatpush1.msra.mxu1 %v386_v16 }
  0xb9   :  { %551 = vmatprep.subr.mxu1 %v383_v18 }
  0xba   :  { %552 = vmatpush1.msra.mxu1 %v382_v20 }
  0xbb   :  { %553 = vmatprep.subr.mxu1 %v379_v22 }
  0xbc   :  { %554 = vmatpush1.msra.mxu1 %v378_v24 }
  0xbd   :  { %555 = vmatprep.subr.mxu1 %v375_v26 }
  0xbe   :  { %556 = vmatpush1.msra.mxu1 %v374_v28 }
  0xbf   :  { %557 = vmatprep.subr.mxu1 %v371_v30 }
  0xc0   :  { %558 = vmatpush1.msra.mxu1 %v370_v32  ;;  %v746_v32 = vld [vmem:[#allocation5 + $0x1f8] sm:$0xff] }
  0xc1   :  { %1259 = vmatprep.subr.mxu1 %v746_v32  ;;  %v702_v32 = vld [vmem:[#allocation5 + $0x98] sm:$0xff] }
 0x159   :  { %v215_v38 = vpop.f32.mrf.mxu1 }
 0x15a   :  { %v216_v44 = vadd.f32 %v215_v38, %v112_v39  ;;  %v697_v38 = vld [vmem:[#allocation5 + $0x70] sm:$0xff] }
 0x15b   :  { %v217_v40 = vpop.f32.mrf.mxu1 }
 0x15c   :  { %v1639_v51 = vadd.f32 %v217_v40, %v116_v42  ;;  %v712_v40 = vld [vmem:[#allocation5 + $0xe8] sm:$0xff] }
 0x15d   :  { %v221_v43 = vpop.f32.mrf.mxu1 }
 0x15e   :  { %v222_v45 = vadd.f32 %v221_v43, %v112_v39  ;;  %v729_v39 = vld [vmem:[#allocation5 + $0x170] sm:$0xff]  ;;  %v728_v43 = vld [vmem:[#allocation5 + $0x168] sm:$0xff] }
 0x15f   :  { %v223_v47 = vpop.f32.mrf.mxu1 }
 0x160   :  { %v360_v52 = vsel %vm356_vm6, %v216_v44, %v222_v45  ;;  %v1643_v53 = vadd.f32 %v223_v47, %v116_v42  ;;  %v1647_v54 = vsel %vm356_vm6, %v222_v45, %v216_v44  ;;  %v696_v42 = vld [vmem:[#allocation5 + $0x68] sm:$0xff]  ;;  %v743_v44 = vld [vmem:[#allocation5 + $0x1e0] sm:$0xff]  ;;  %v710_v47 = vld [vmem:[#allocation5 + $0xd8] sm:$0xff] }
 0x161   :  { %v1209_v55 = vmul.f32 -1.442695, %v360_v52  ;;  %v292_v56 = vpop.f32.mrf.mxu1  ;;  %v695_v45 = vld [vmem:[#allocation5 + $0x60] sm:$0xff]  ;;  %v726_v52 = vld [vmem:[#allocation5 + $0x158] sm:$0xff] }
 0x162   :  { %v361_v3 = vsel %vm1633_vm7, %v1639_v51, %v1643_v53  ;;  %v365_v59 = vsel %vm1633_vm7, %v1643_v53, %v1639_v51  ;;  %v1661_v5 = vadd.f32 %v292_v56, %v120_v58  ;;  %v741_v56 = vld [vmem:[#allocation5 + $0x1d0] sm:$0xff] }
 0x163   :  { %1425 = vpow2.f32 %v1209_v55  ;;  %v1210_v60 = vmul.f32 -1.442695, %v361_v3  ;;  %v294_v61 = vpop.f32.mrf.mxu1  ;;  %v709_v55 = vld [vmem:[#allocation5 + $0xd0] sm:$0xff] }
 0x164   :  { %v1669_v9 = vadd.f32 %v294_v61, %v124_v63  ;;  %v725_v3 = vld [vmem:[#allocation5 + $0x150] sm:$0xff]  ;;  %v692_v61 = vld [vmem:[#allocation5 + $0x48] sm:$0xff] }
 0x165   :  { %1427 = vpow2.f32 %v1210_v60  ;;  %v298_v0 = vpop.f32.mrf.mxu1  ;;  %v740_v60 = vld [vmem:[#allocation5 + $0x1c8] sm:$0xff] }
 0x166   :  { %v1663_v6 = vadd.f32 %v298_v0, %v120_v58  ;;  %v708_v58 = vld [vmem:[#allocation5 + $0xc8] sm:$0xff]  ;;  %v739_v0 = vld [vmem:[#allocation5 + $0x1c0] sm:$0xff] }
 0x167   :  { %v300_v7 = vpop.f32.mrf.mxu1 }
 0x168   :  { %v1671_v10 = vadd.f32 %v300_v7, %v124_v63  ;;  %v366_v11 = vsel %vm1657_vm8, %v1663_v6, %v1661_v5  ;;  %v362_v17 = vsel %vm1657_vm8, %v1661_v5, %v1663_v6  ;;  %v707_v63 = vld [vmem:[#allocation5 + $0xc0] sm:$0xff] }
 0x169   :  { %v691_v7 = vld [vmem:[#allocation5 + $0x40] sm:$0xff] }
 0x16a   :  { %v367_v12 = vsel %vm1665_vm9, %v1671_v10, %v1669_v9  ;;  %v363_v13 = vsel %vm1665_vm9, %v1669_v9, %v1671_v10 }
 0x16b   :  { %v1211_v14 = vmul.f32 -1.442695, %v363_v13  ;;  %v723_v13 = vld [vmem:[#allocation5 + $0x140] sm:$0xff] }
 0x16d   :  { %1429 = vpow2.f32 %v1211_v14  ;;  %v706_v14 = vld [vmem:[#allocation5 + $0xb8] sm:$0xff] }
 0x170   :  { %v1426_v15 = vpop.eup %1425 }
 0x171   :  { %v435_v16 = vadd.f32 1.0, %v1426_v15  ;;  %v738_v15 = vld [vmem:[#allocation5 + $0x1b8] sm:$0xff] }
 0x172   :  { %v1428_v18 = vpop.eup %1427 }
 0x173   :  { %1431 = vrcp.f32 %v435_v16  ;;  %v441_v19 = vadd.f32 1.0, %v1428_v18  ;;  %v690_v16 = vld [vmem:[#allocation5 + $0x38] sm:$0xff]  ;;  %v705_v18 = vld [vmem:[#allocation5 + $0xb0] sm:$0xff] }
 0x174   :  { %1433 = vtanh.f32 %v362_v17  ;;  %v722_v17 = vld [vmem:[#allocation5 + $0x138] sm:$0xff] }
 0x175   :  { %1435 = vrcp.f32 %v441_v19  ;;  %v737_v19 = vld [vmem:[#allocation5 + $0x1b0] sm:$0xff] }
 0x17a   :  { %v1430_v20 = vpop.eup %1429 }
 0x17b   :  { %v448_v24 = vadd.f32 1.0, %v1430_v20  ;;  %v689_v20 = vld [vmem:[#allocation5 + $0x30] sm:$0xff] }
 0x17d   :  { %1437 = vrcp.f32 %v448_v24  ;;  %v688_v24 = vld [vmem:[#allocation5 + $0x28] sm:$0xff] }
 0x180   :  { %v1432_v21 = vpop.eup %1431 }
 0x181   :  { %v1434_v22 = vpop.eup %1433 }
 0x182   :  { %v1436_v23 = vpop.eup %1435  ;;  %v452_v26 = vmul.f32 %v1434_v22, %v1432_v21  ;;  %v721_v21 = vld [vmem:[#allocation5 + $0x130] sm:$0xff]  ;;  %v704_v22 = vld [vmem:[#allocation5 + $0xa8] sm:$0xff] }
 0x183   :  { %v451_v25 = vmul.f32 0.0, %v1436_v23  ;;  %v736_v23 = vld [vmem:[#allocation5 + $0x1a8] sm:$0xff] }
 0x185   :  { %v1689_v27 = vadd.f32 %v452_v26, %v451_v25  ;;  %v720_v25 = vld [vmem:[#allocation5 + $0x128] sm:$0xff]  ;;  %v703_v26 = vld [vmem:[#allocation5 + $0xa0] sm:$0xff] }
 0x187   :  { %1439 = vtanh.f32 %v1689_v27 }
 0x18a   :  { %v1438_v28 = vpop.eup %1437 }
 0x194   :  { %v1440_v29 = vpop.eup %1439 }
 0x195   :  { %v1692_v30 = vmul.f32 %v1440_v29, %v1438_v28  ;;  %v735_v28 = vld [vmem:[#allocation5 + $0x1a0] sm:$0xff] }
 0x196   :  { %v687_v29 = vld [vmem:[#allocation5 + $0x20] sm:$0xff] }
 0x197   :  { %521 = vmatmul.mubr.f32.vlgmr.msra.gmra.mxu0 %v1692_v30  ;;  %592 = vmatmul.mubr.f32.vlgmr.msra.gmra.mxu1 %v1692_v30 }
 0x198   :  { %1225 = vmatpush3.msra.mxu0 %v698_v34  ;;  %1260 = vmatpush3.msra.mxu1 %v730_v35  ;;  %v734_v34 = vld [vmem:[#allocation5 + $0x198] sm:$0xff] }
 0x199   :  { %1226 = vmatprep.subr.mxu0 %v713_v36  ;;  %1261 = vmatprep.subr.mxu1 %v745_v37  ;;  %v686_v35 = vld [vmem:[#allocation5 + $0x18] sm:$0xff]  ;;  %v701_v37 = vld [vmem:[#allocation5 + $0x90] sm:$0xff] }
 0x19a   :  { %1227 = vmatpush3.msra.mxu0 %v697_v38  ;;  %1262 = vmatpush3.msra.mxu1 %v729_v39  ;;  %v718_v36 = vld [vmem:[#allocation5 + $0x118] sm:$0xff]  ;;  %v733_v38 = vld [vmem:[#allocation5 + $0x190] sm:$0xff] }
 0x19b   :  { %1228 = vmatprep.subr.mxu0 %v712_v40  ;;  %1263 = vmatprep.subr.mxu1 %v744_v41  ;;  %v685_v39 = vld [vmem:[#allocation5 + $0x10] sm:$0xff]  ;;  %v700_v41 = vld [vmem:[#allocation5 + $0x88] sm:$0xff] }
 0x19c   :  { %1229 = vmatpush3.msra.mxu0 %v696_v42  ;;  %1264 = vmatpush3.msra.mxu1 %v728_v43  ;;  %v717_v40 = vld [vmem:[#allocation5 + $0x110] sm:$0xff]  ;;  %v732_v42 = vld [vmem:[#allocation5 + $0x188] sm:$0xff] }
 0x19d   :  { %1230 = vmatprep.subr.mxu0 %v711_v1  ;;  %1265 = vmatprep.subr.mxu1 %v743_v44  ;;  %v684_v43 = vld [vmem:[#allocation5 + $0x8] sm:$0xff]  ;;  %v699_v44 = vld [vmem:[#allocation5 + $0x80] sm:$0xff] }
 0x19e   :  { %1231 = vmatpush3.msra.mxu0 %v695_v45  ;;  %1266 = vmatpush3.msra.mxu1 %v727_v46  ;;  %v716_v1 = vld [vmem:[#allocation5 + $0x108] sm:$0xff]  ;;  %v731_v45 = vld [vmem:[#allocation5 + $0x180] sm:$0xff] }
 0x19f   :  { %1232 = vmatprep.subr.mxu0 %v710_v47  ;;  %1267 = vmatprep.subr.mxu1 %v742_v49  ;;  %v683_v46 = vld [vmem:[#allocation5] sm:$0xff]  ;;  %v778_v49 = vld [vmem:[#allocation5 + $0x2f8] sm:$0xff] }
 0x1a0   :  { %1233 = vmatpush3.msra.mxu0 %v694_v50  ;;  %1268 = vmatpush3.msra.mxu1 %v726_v52  ;;  %v715_v47 = vld [vmem:[#allocation5 + $0x100] sm:$0xff]  ;;  %v810_v50 = vld [vmem:[#allocation5 + $0x3f8] sm:$0xff] }
 0x1a1   :  { %1234 = vmatprep.subr.mxu0 %v709_v55  ;;  %1269 = vmatprep.subr.mxu1 %v741_v56 }
 0x1a2   :  { %1235 = vmatpush3.msra.mxu0 %v693_v57  ;;  %1270 = vmatpush3.msra.mxu1 %v725_v3 }
 0x1a3   :  { %1236 = vmatprep.subr.mxu0 %v708_v58  ;;  %1271 = vmatprep.subr.mxu1 %v740_v60 }
 0x1a4   :  { %1237 = vmatpush3.msra.mxu0 %v692_v61  ;;  %1272 = vmatpush3.msra.mxu1 %v724_v62 }
 0x1a5   :  { %1238 = vmatprep.subr.mxu0 %v707_v63  ;;  %1273 = vmatprep.subr.mxu1 %v739_v0 }
 0x1a6   :  { %1239 = vmatpush3.msra.mxu0 %v691_v7  ;;  %1274 = vmatpush3.msra.mxu1 %v723_v13 }
 0x1a7   :  { %1240 = vmatprep.subr.mxu0 %v706_v14  ;;  %1275 = vmatprep.subr.mxu1 %v738_v15  ;;  %v629_v15 = vld [vmem:[%s1827_s4] sm:$0xff] }
 0x1a8   :  { %1241 = vmatpush3.msra.mxu0 %v690_v16  ;;  %1276 = vmatpush3.msra.mxu1 %v722_v17 }
 0x1a9   :  { %1242 = vmatprep.subr.mxu0 %v705_v18  ;;  %1277 = vmatprep.subr.mxu1 %v737_v19 }
 0x1aa   :  { %1243 = vmatpush3.msra.mxu0 %v689_v20  ;;  %1278 = vmatpush3.msra.mxu1 %v721_v21 }
 0x1ab   :  { %1244 = vmatprep.subr.mxu0 %v704_v22  ;;  %1279 = vmatprep.subr.mxu1 %v736_v23 }
 0x1ac   :  { %1245 = vmatpush3.msra.mxu0 %v688_v24  ;;  %1280 = vmatpush3.msra.mxu1 %v720_v25 }
 0x1ad   :  { %1246 = vmatprep.subr.mxu0 %v703_v26  ;;  %1281 = vmatprep.subr.mxu1 %v735_v28 }
 0x1ae   :  { %1247 = vmatpush3.msra.mxu0 %v687_v29  ;;  %1282 = vmatpush3.msra.mxu1 %v719_v31 }
 0x1af   :  { %1248 = vmatprep.subr.mxu0 %v702_v32  ;;  %1283 = vmatprep.subr.mxu1 %v734_v34  ;;  %v762_v32 = vld [vmem:[#allocation5 + $0x278] sm:$0xff] }
 0x1b0   :  { %1249 = vmatpush3.msra.mxu0 %v686_v35  ;;  %1284 = vmatpush3.msra.mxu1 %v718_v36  ;;  %v794_v34 = vld [vmem:[#allocation5 + $0x378] sm:$0xff]  ;;  %v777_v36 = vld [vmem:[#allocation5 + $0x2f0] sm:$0xff] }
 0x1b1   :  { %1250 = vmatprep.subr.mxu0 %v701_v37  ;;  %1285 = vmatprep.subr.mxu1 %v733_v38 }
 0x1b2   :  { %1251 = vmatpush3.msra.mxu0 %v685_v39  ;;  %1286 = vmatpush3.msra.mxu1 %v717_v40  ;;  %v809_v39 = vld [vmem:[#allocation5 + $0x3f0] sm:$0xff] }
 0x1b3   :  { %1252 = vmatprep.subr.mxu0 %v700_v41  ;;  %1287 = vmatprep.subr.mxu1 %v732_v42  ;;  %v761_v42 = vld [vmem:[#allocation5 + $0x270] sm:$0xff] }
 0x1b4   :  { %1253 = vmatpush3.msra.mxu0 %v684_v43  ;;  %1288 = vmatpush3.msra.mxu1 %v716_v1  ;;  %v793_v43 = vld [vmem:[#allocation5 + $0x370] sm:$0xff]  ;;  %v776_v1 = vld [vmem:[#allocation5 + $0x2e8] sm:$0xff] }
 0x1b5   :  { %1254 = vmatprep.subr.mxu0 %v699_v44  ;;  %1289 = vmatprep.subr.mxu1 %v731_v45  ;;  %v808_v44 = vld [vmem:[#allocation5 + $0x3e8] sm:$0xff] }
 0x1b6   :  { %1255 = vmatpush3.msra.mxu0 %v683_v46  ;;  %1290 = vmatpush3.msra.mxu1 %v715_v47  ;;  %v760_v45 = vld [vmem:[#allocation5 + $0x268] sm:$0xff]  ;;  %v775_v47 = vld [vmem:[#allocation5 + $0x2e0] sm:$0xff] }
 0x1b7   :  { %1294 = vmatprep.subr.mxu0 %v778_v49  ;;  %1329 = vmatprep.subr.mxu1 %v810_v50  ;;  %v792_v46 = vld [vmem:[#allocation5 + $0x368] sm:$0xff]  ;;  %v807_v49 = vld [vmem:[#allocation5 + $0x3e0] sm:$0xff] }
 0x1b8   :  { %v759_v50 = vld [vmem:[#allocation5 + $0x260] sm:$0xff] }
 0x257   :  { %v522_v52 = vpop.f32.mrf.mxu0  ;;  %v593_v58 = vpop.f32.mrf.mxu1 }
 0x258   :  { %v598_v55 = vadd.f32 %v522_v52, %v1647_v54  ;;  %v600_v48 = vadd.f32 %v593_v58, %v366_v11  ;;  %v791_v52 = vld [vmem:[#allocation5 + $0x360] sm:$0xff]  ;;  %v773_v58 = vld [vmem:[#allocation5 + $0x2d0] sm:$0xff] }
 0x259   :  { %v524_v56 = vpop.f32.mrf.mxu0  ;;  %v595_v61 = vpop.f32.mrf.mxu1 }
 0x25a   :  { %v1212_v57 = vmul.f32 -1.442695, %v598_v55  ;;  %v599_v3 = vadd.f32 %v524_v56, %v365_v59  ;;  %v601_v62 = vadd.f32 %v595_v61, %v367_v12  ;;  %v774_v55 = vld [vmem:[#allocation5 + $0x2d8] sm:$0xff]  ;;  %v757_v61 = vld [vmem:[#allocation5 + $0x250] sm:$0xff] }
 0x25b   :  { %v806_v56 = vld [vmem:[#allocation5 + $0x3d8] sm:$0xff] }
 0x25c   :  { %1441 = vpow2.f32 %v1212_v57  ;;  %v1213_v60 = vmul.f32 -1.442695, %v599_v3  ;;  %v1214_v54 = vmul.f32 -1.442695, %v601_v62  ;;  %v758_v57 = vld [vmem:[#allocation5 + $0x258] sm:$0xff]  ;;  %v789_v62 = vld [vmem:[#allocation5 + $0x350] sm:$0xff] }
 0x25d   :  { %v790_v3 = vld [vmem:[#allocation5 + $0x358] sm:$0xff] }
 0x25e   :  { %1443 = vpow2.f32 %v1213_v60  ;;  %v805_v60 = vld [vmem:[#allocation5 + $0x3d0] sm:$0xff] }
 0x25f   :  { %1445 = vtanh.f32 %v600_v48  ;;  %v772_v48 = vld [vmem:[#allocation5 + $0x2c8] sm:$0xff] }
 0x260   :  { %1447 = vpow2.f32 %v1214_v54  ;;  %v804_v54 = vld [vmem:[#allocation5 + $0x3c8] sm:$0xff] }
 0x269   :  { %v1442_v51 = vpop.eup %1441 }
 0x26a   :  { %v605_v53 = vadd.f32 1.0, %v1442_v51  ;;  %v756_v51 = vld [vmem:[#allocation5 + $0x248] sm:$0xff] }
 0x26b   :  { %v1444_v59 = vpop.eup %1443 }
 0x26c   :  { %1449 = vrcp.f32 %v605_v53  ;;  %v611_v63 = vadd.f32 1.0, %v1444_v59  ;;  %v1446_v8 = vpop.eup %1445  ;;  %v788_v53 = vld [vmem:[#allocation5 + $0x348] sm:$0xff]  ;;  %v771_v59 = vld [vmem:[#allocation5 + $0x2c0] sm:$0xff] }
 0x26d   :  { %v1448_v0 = vpop.eup %1447 }
 0x26e   :  { %1451 = vrcp.f32 %v611_v63  ;;  %v618_v12 = vadd.f32 1.0, %v1448_v0  ;;  %v803_v63 = vld [vmem:[#allocation5 + $0x3c0] sm:$0xff] }
 0x26f   :  { %v787_v0 = vld [vmem:[#allocation5 + $0x340] sm:$0xff] }
 0x270   :  { %1453 = vrcp.f32 %v618_v12  ;;  %v786_v12 = vld [vmem:[#allocation5 + $0x338] sm:$0xff] }
 0x279   :  { %v1450_v7 = vpop.eup %1449 }
 0x27a   :  { %v622_v9 = vmul.f32 %v1450_v7, %v1446_v8  ;;  %v755_v8 = vld [vmem:[#allocation5 + $0x240] sm:$0xff]  ;;  %v770_v7 = vld [vmem:[#allocation5 + $0x2b8] sm:$0xff] }
 0x27b   :  { %v1452_v10 = vpop.eup %1451 }
 0x27c   :  { %v621_v4 = vmul.f32 %v1452_v10, %v1689_v27  ;;  %v1215_v27 = vld [vmem:[%s1827_s4 + $0x8] sm:$0xff]  ;;  %v754_v10 = vld [vmem:[#allocation5 + $0x238] sm:$0xff] }
 0x27d   :  { %v1454_v5 = vpop.eup %1453 }
 0x27e   :  { %v623_v13 = vadd.f32 %v622_v9, %v621_v4  ;;  %v802_v9 = vld [vmem:[#allocation5 + $0x3b8] sm:$0xff]  ;;  %v769_v4 = vld [vmem:[#allocation5 + $0x2b0] sm:$0xff] }
 0x280   :  { %1455 = vtanh.f32 %v623_v13  ;;  %v801_v13 = vld [vmem:[#allocation5 + $0x3b0] sm:$0xff] }
 0x28d   :  { %v1456_v6 = vpop.eup %1455 }
 0x28e   :  { %v625_v11 = vmul.f32 %v1456_v6, %v1454_v5  ;;  %v753_v5 = vld [vmem:[#allocation5 + $0x230] sm:$0xff] }
 0x28f   :  { %v785_v6 = vld [vmem:[#allocation5 + $0x330] sm:$0xff] }
 0x290   :  { %v627_v14 = vsel %vm356_vm6, %v1692_v30, %v625_v11  ;;  %v646_v16 = vsel %vm356_vm6, %v625_v11, %v1692_v30  ;;  %v768_v11 = vld [vmem:[#allocation5 + $0x2a8] sm:$0xff] }
 0x291   :  { %v628_v17 = vmax.f32 %v627_v14, 0.0  ;;  %v647_v18 = vmax.f32 %v646_v16, 0.0  ;;  %v800_v14 = vld [vmem:[#allocation5 + $0x3a8] sm:$0xff] }
 0x292   :  { %v784_v16 = vld [vmem:[#allocation5 + $0x328] sm:$0xff] }
 0x293   :  { %v1725_v19 = vmul.f32 %v629_v15, %v628_v17  ;;  %v1727_v20 = vmul.f32 %v1215_v27, %v647_v18  ;;  %v752_v15 = vld [vmem:[#allocation5 + $0x228] sm:$0xff]  ;;  %v767_v27 = vld [vmem:[#allocation5 + $0x2a0] sm:$0xff] }
 0x294   :  { %v799_v17 = vld [vmem:[#allocation5 + $0x3a0] sm:$0xff] }
 0x295   :  { %v632_v21 = vrot.slane %v1725_v19, 1  ;;  %v636_v22 = vrot.slane %v1725_v19, 3  ;;  %v1218_v23 = vrot.slane %v1727_v20, 10  ;;  %v658_v33 = vrot.slane %v1727_v20, 7  ;;  %v751_v18 = vld [vmem:[#allocation5 + $0x220] sm:$0xff] }
 0x296   :  { %v634_v30 = vrot.slane %v1725_v19, 2  ;;  %v1217_v24 = vrot.slane %v1727_v20, 9  ;;  %v640_v25 = vrot.slane %v1725_v19, 5  ;;  %v1220_v26 = vrot.slane %v1727_v20, 12 }
 0x297   :  { %v676_v28 = vsel %vm674_vm10, %v632_v21, %v1727_v20  ;;  %v678_v29 = vsel %vm674_vm10, %v636_v22, %v1218_v23  ;;  %v675_v31 = vsel %vm674_vm10, %v1725_v19, %v658_v33  ;;  %v644_v37 = vrot.slane %v1725_v19, 7  ;;  %v783_v21 = vld [vmem:[#allocation5 + $0x320] sm:$0xff]  ;;  %v766_v22 = vld [vmem:[#allocation5 + $0x298] sm:$0xff] }
 0x298   :  { %882 = vmatprep.mubr.f32.mxu0 %v676_v28  ;;  %952 = vmatprep.mubr.f32.mxu1 %v678_v29  ;;  %v677_v35 = vsel %vm674_vm10, %v634_v30, %v1217_v24  ;;  %v665_v38 = vrot.slane %v658_v33, 7  ;;  %v680_v40 = vsel %vm674_vm10, %v640_v25, %v1220_v26  ;;  %v798_v23 = vld [vmem:[#allocation5 + $0x398] sm:$0xff]  ;;  %v765_v24 = vld [vmem:[#allocation5 + $0x290] sm:$0xff]  ;;  %v764_v29 = vld [vmem:[#allocation5 + $0x288] sm:$0xff] }
 0x299   :  { %883 = vmatmul.mubr.f32.vlgmr.msra.gmra.mxu0 %v675_v31  ;;  %953 = vmatmul.mubr.f32.vlgmr.msra.gmra.mxu1 %v677_v35  ;;  %v750_v33 = vld [vmem:[#allocation5 + $0x218] sm:$0xff]  ;;  %v797_v25 = vld [vmem:[#allocation5 + $0x390] sm:$0xff]  ;;  %v796_v31 = vld [vmem:[#allocation5 + $0x388] sm:$0xff] }
 0x29a   :  { %1295 = vmatpush3.msra.mxu0 %v762_v32  ;;  %1330 = vmatpush3.msra.mxu1 %v794_v34  ;;  %v682_v41 = vsel %vm674_vm10, %v644_v37, %v665_v38  ;;  %v782_v30 = vld [vmem:[#allocation5 + $0x318] sm:$0xff]  ;;  %v749_v26 = vld [vmem:[#allocation5 + $0x210] sm:$0xff]  ;;  %v748_v32 = vld [vmem:[#allocation5 + $0x208] sm:$0xff]  ;;  %v638_v37 = vrot.slane %v1725_v19, 4  ;;  %v1219_v38 = vrot.slane %v1727_v20, 11 }
 0x29b   :  { %1296 = vmatprep.subr.mxu0 %v777_v36  ;;  %1022 = vmatprep.mubr.f32.mxu0 %v680_v40  ;;  %v781_v28 = vld [vmem:[#allocation5 + $0x310] sm:$0xff]  ;;  %v780_v34 = vld [vmem:[#allocation5 + $0x308] sm:$0xff]  ;;  %v763_v35 = vld [vmem:[#allocation5 + $0x280] sm:$0xff]  ;;  %v1221_v40 = vrot.slane %v1727_v20, 13 }
 0x29c   :  { %1331 = vmatprep.subr.mxu1 %v809_v39  ;;  %1092 = vmatprep.mubr.f32.mxu1 %v682_v41  ;;  %v795_v36 = vld [vmem:[#allocation5 + $0x380] sm:$0xff]  ;;  %v642_v39 = vrot.slane %v1725_v19, 6  ;;  %v1114_v19 = vld [vmem:[%s1830_s7 + $0x78] sm:$0xff]  ;;  %v1113_v20 = vld [vmem:[%s1830_s7 + $0x70] sm:$0xff] }
 0x29d   :  { %1297 = vmatpush3.msra.mxu0 %v761_v42  ;;  %1332 = vmatpush3.msra.mxu1 %v793_v43  ;;  %v747_v41 = vld [vmem:[#allocation5 + $0x200] sm:$0xff]  ;;  %v679_v43 = vsel %vm674_vm10, %v638_v37, %v1219_v38 }
 0x29e   :  { %1298 = vmatprep.subr.mxu0 %v776_v1  ;;  %1333 = vmatprep.subr.mxu1 %v808_v44  ;;  %v779_v42 = vld [vmem:[#allocation5 + $0x300] sm:$0xff]  ;;  %v681_v1 = vsel %vm674_vm10, %v642_v39, %v1221_v40 }
 0x29f   :  { %1299 = vmatpush3.msra.mxu0 %v760_v45  ;;  %1334 = vmatpush3.msra.mxu1 %v792_v46  ;;  %v1112_v44 = vld [vmem:[%s1830_s7 + $0x68] sm:$0xff]  ;;  %v1111_v45 = vld [vmem:[%s1830_s7 + $0x60] sm:$0xff]  ;;  %v1110_v46 = vld [vmem:[%s1830_s7 + $0x58] sm:$0xff] }
 0x2a0   :  { %1300 = vmatprep.subr.mxu0 %v775_v47  ;;  %1335 = vmatprep.subr.mxu1 %v807_v49  ;;  %v1109_v47 = vld [vmem:[%s1830_s7 + $0x50] sm:$0xff]  ;;  %v1108_v49 = vld [vmem:[%s1830_s7 + $0x48] sm:$0xff] }
 0x2a1   :  { %1301 = vmatpush3.msra.mxu0 %v759_v50  ;;  %1336 = vmatpush3.msra.mxu1 %v791_v52  ;;  %v1107_v50 = vld [vmem:[%s1830_s7 + $0x40] sm:$0xff]  ;;  %v1106_v52 = vld [vmem:[%s1830_s7 + $0x38] sm:$0xff] }
 0x2a2   :  { %1302 = vmatprep.subr.mxu0 %v774_v55  ;;  %1337 = vmatprep.subr.mxu1 %v806_v56  ;;  %v1105_v55 = vld [vmem:[%s1830_s7 + $0x30] sm:$0xff]  ;;  %v1104_v56 = vld [vmem:[%s1830_s7 + $0x28] sm:$0xff] }
 0x2a3   :  { %1303 = vmatpush3.msra.mxu0 %v758_v57  ;;  %1338 = vmatpush3.msra.mxu1 %v790_v3  ;;  %v1103_v57 = vld [vmem:[%s1830_s7 + $0x20] sm:$0xff]  ;;  %v1102_v3 = vld [vmem:[%s1830_s7 + $0x18] sm:$0xff] }
 0x2a4   :  { %1304 = vmatprep.subr.mxu0 %v773_v58  ;;  %1339 = vmatprep.subr.mxu1 %v805_v60  ;;  %v1101_v58 = vld [vmem:[%s1830_s7 + $0x10] sm:$0xff]  ;;  %v1100_v60 = vld [vmem:[%s1830_s7 + $0x8] sm:$0xff] }
 0x2a5   :  { %1305 = vmatpush3.msra.mxu0 %v757_v61  ;;  %1340 = vmatpush3.msra.mxu1 %v789_v62  ;;  %v1099_v61 = vld [vmem:[%s1830_s7] sm:$0xff] }
 0x2a6   :  { %1306 = vmatprep.subr.mxu0 %v772_v48  ;;  %1341 = vmatprep.subr.mxu1 %v804_v54 }
 0x2a7   :  { %1307 = vmatpush3.msra.mxu0 %v756_v51  ;;  %1342 = vmatpush3.msra.mxu1 %v788_v53  ;;  %v1222_v53 = vld [vmem:[%s1829_s6] ss:$0 sm:$0xff] }
 0x2a8   :  { %1308 = vmatprep.subr.mxu0 %v771_v59  ;;  %1343 = vmatprep.subr.mxu1 %v803_v63 }
 0x2a9   :  { %1309 = vmatpush3.msra.mxu0 %v755_v8  ;;  %1344 = vmatpush3.msra.mxu1 %v787_v0 }
 0x2aa   :  { %1310 = vmatprep.subr.mxu0 %v770_v7  ;;  %1345 = vmatprep.subr.mxu1 %v802_v9 }
 0x2ab   :  { %1311 = vmatpush3.msra.mxu0 %v754_v10  ;;  %1346 = vmatpush3.msra.mxu1 %v786_v12 }
 0x2ac   :  { %1312 = vmatprep.subr.mxu0 %v769_v4  ;;  %1347 = vmatprep.subr.mxu1 %v801_v13 }
 0x2ad   :  { %1313 = vmatpush3.msra.mxu0 %v753_v5  ;;  %1348 = vmatpush3.msra.mxu1 %v785_v6 }
 0x2ae   :  { %1314 = vmatprep.subr.mxu0 %v768_v11  ;;  %1349 = vmatprep.subr.mxu1 %v800_v14  ;;  %v1223_v11 = vld [vmem:[#allocation2] ss:$0 sm:$0xff] }
 0x2af   :  { %1315 = vmatpush3.msra.mxu0 %v752_v15  ;;  %1350 = vmatpush3.msra.mxu1 %v784_v16 }
 0x2b0   :  { %1316 = vmatprep.subr.mxu0 %v767_v27  ;;  %1351 = vmatprep.subr.mxu1 %v799_v17 }
 0x2b1   :  { %1317 = vmatpush3.msra.mxu0 %v751_v18  ;;  %1352 = vmatpush3.msra.mxu1 %v783_v21 }
 0x2b2   :  { %1318 = vmatprep.subr.mxu0 %v766_v22  ;;  %1353 = vmatprep.subr.mxu1 %v798_v23 }
 0x2b3   :  { %1319 = vmatpush3.msra.mxu0 %v750_v33  ;;  %1354 = vmatpush3.msra.mxu1 %v782_v30 }
 0x2b4   :  { %1320 = vmatprep.subr.mxu0 %v765_v24  ;;  %1355 = vmatprep.subr.mxu1 %v797_v25 }
 0x2b5   :  { %1321 = vmatpush3.msra.mxu0 %v749_v26  ;;  %1356 = vmatpush3.msra.mxu1 %v781_v28 }
 0x2b6   :  { %1322 = vmatprep.subr.mxu0 %v764_v29  ;;  %1357 = vmatprep.subr.mxu1 %v796_v31 }
 0x2b7   :  { %1323 = vmatpush3.msra.mxu0 %v748_v32  ;;  %1358 = vmatpush3.msra.mxu1 %v780_v34 }
 0x2b8   :  { %1324 = vmatprep.subr.mxu0 %v763_v35  ;;  %1359 = vmatprep.subr.mxu1 %v795_v36 }
 0x2b9   :  { %1325 = vmatpush3.msra.mxu0 %v747_v41  ;;  %1360 = vmatpush3.msra.mxu1 %v779_v42 }
 0x2ba   :  { %1023 = vmatmul.mubr.f32.vlgmr.msra.gmra.mxu0 %v679_v43  ;;  %1093 = vmatmul.mubr.f32.vlgmr.msra.gmra.mxu1 %v681_v1 }
 0x2bb   :  { %1381 = vmatprep.subr.mxu0 %v1507_v2  ;;  %1413 = vmatprep.mubr.msk.f32.mxu0 %vm1509_vm11, %v1507_v2 }
 0x2bc   :  { %1382 = vmatpush3.msra.mxu0 %v1114_v19 }
 0x2bd   :  { %1383 = vmatprep.subr.mxu0 %v1507_v2 }
 0x2be   :  { %1384 = vmatpush3.msra.mxu0 %v1113_v20 }
 0x2bf   :  { %1385 = vmatprep.subr.mxu0 %v1507_v2 }
 0x2c0   :  { %1386 = vmatpush3.msra.mxu0 %v1112_v44 }
 0x2c1   :  { %1387 = vmatprep.subr.mxu0 %v1507_v2 }
 0x2c2   :  { %1388 = vmatpush3.msra.mxu0 %v1111_v45 }
 0x2c3   :  { %1389 = vmatprep.subr.mxu0 %v1507_v2 }
 0x2c4   :  { %1390 = vmatpush3.msra.mxu0 %v1110_v46 }
 0x2c5   :  { %1391 = vmatprep.subr.mxu0 %v1507_v2 }
 0x2c6   :  { %1392 = vmatpush3.msra.mxu0 %v1109_v47 }
 0x2c7   :  { %1393 = vmatprep.subr.mxu0 %v1507_v2 }
 0x2c8   :  { %1394 = vmatpush3.msra.mxu0 %v1108_v49 }
 0x2c9   :  { %1395 = vmatprep.subr.mxu0 %v1507_v2 }
 0x2ca   :  { %1396 = vmatpush3.msra.mxu0 %v1107_v50 }
 0x2cb   :  { %1397 = vmatprep.subr.mxu0 %v1507_v2 }
 0x2cc   :  { %1398 = vmatpush3.msra.mxu0 %v1106_v52 }
 0x2cd   :  { %1399 = vmatprep.subr.mxu0 %v1507_v2 }
 0x2ce   :  { %1400 = vmatpush3.msra.mxu0 %v1105_v55 }
 0x2cf   :  { %1401 = vmatprep.subr.mxu0 %v1507_v2 }
 0x2d0   :  { %1402 = vmatpush3.msra.mxu0 %v1104_v56 }
 0x2d1   :  { %1403 = vmatprep.subr.mxu0 %v1507_v2 }
 0x2d2   :  { %1404 = vmatpush3.msra.mxu0 %v1103_v57 }
 0x2d3   :  { %1405 = vmatprep.subr.mxu0 %v1507_v2 }
 0x2d4   :  { %1406 = vmatpush3.msra.mxu0 %v1102_v3 }
 0x2d5   :  { %1407 = vmatprep.subr.mxu0 %v1507_v2 }
 0x2d6   :  { %1408 = vmatpush3.msra.mxu0 %v1101_v58 }
 0x2d7   :  { %1409 = vmatprep.subr.mxu0 %v1507_v2 }
 0x2d8   :  { %1410 = vmatpush3.msra.mxu0 %v1100_v60 }
 0x2d9   :  { %1411 = vmatprep.subr.mxu0 %v1507_v2 }
 0x2da   :  { %1412 = vmatpush3.msra.mxu0 %v1099_v61 }
 0x359   :  { %v1256_v62 = vpop.f32.mrf.mxu0  ;;  %v1291_v54 = vpop.f32.mrf.mxu1 }
 0x35b   :  { %v1257_v48 = vpop.f32.mrf.mxu0  ;;  %v1292_v59 = vpop.f32.mrf.mxu1 }
 0x35c   :  { %v1258_v51 = vadd.f32 %v1257_v48, %v1256_v62  ;;  %v1293_v7 = vadd.f32 %v1292_v59, %v1291_v54 }
 0x35e   :  { %v885_v63 = vadd.f32 %v1258_v51, %v1222_v53 }
 0x360   :  { %v955_v12 = vadd.f32 %v1293_v7, %v885_v63 }
 0x37a   :  { %v1326_v8 = vpop.f32.mrf.mxu0  ;;  %v1361_v0 = vpop.f32.mrf.mxu1 }
 0x37c   :  { %v1327_v9 = vpop.f32.mrf.mxu0  ;;  %v1362_v10 = vpop.f32.mrf.mxu1 }
 0x37d   :  { %v1328_v4 = vadd.f32 %v1327_v9, %v1326_v8  ;;  %v1363_v2 = vadd.f32 %v1362_v10, %v1361_v0 }
 0x37f   :  { %v1025_v13 = vadd.f32 %v1328_v4, %v955_v12 }
 0x381   :  { %v1095_v5 = vadd.f32 %v1363_v2, %v1025_v13 }
 0x383   :  { %v1098_v6 = vmax.f32 %v1095_v5, 0.0 }
 0x385   :  { %1414 = vmatmul.mubr.f32.vlgmr.msra.gmra.mxu0 %v1098_v6 }
 0x445   :  { %v1188_v14 = vpop.f32.mrf.mxu0 }
 0x446   :  { %v1189_v15 = vadd.f32 %v1223_v11, %v1188_v14 }
 0x447   :  { %v1415_v16 = vpop.f32.mrf.mxu0 }
 0x448   :  { %1193 = vst.msk [vmem:[%s1832_s9] sm:$0x3] %vm1192_vm12, %v1189_v15 }
 0x449   :  { %1198 = vsyncpa [#allocation4], 1 }
 0x44a   :  { %1199 = vsyncpa [#allocation6], 1 }

</bundles_post_ra>
